<compile_context>
chip_gen: v5e
topology: v5e:2x2
jax: 0.10.0
libtpu: 0.0.40
codegen_flags: <defaults>
</compile_context>

<pallas_src>
import jax
import jax.numpy as jnp
from jax.experimental import pallas as pl
from jax.experimental.pallas import tpu as pltpu

NEG_SLOPE = 0.01  # PyTorch nn.LeakyReLU default


def _leaky(v):
    return jnp.where(v >= 0, v, NEG_SLOPE * v)


def global_component_kernel(x_ref, w1_ref, b1_ref, w2_ref, b2_ref, o_ref):
    """One batch element per grid step.

    x_ref / o_ref : (C, HW)  streamed tile (batch dim squeezed out of the block)
    w1_ref, w2_ref: (C, C)   PyTorch Linear weights (out, in), VMEM-resident
    b1_ref, b2_ref: (C, 1)   biases as column vectors
    """
    # --- global average pool over spatial (lane reduction), f32 accumulation ---
    pooled = jnp.mean(x_ref[...].astype(jnp.float32), axis=-1, keepdims=True)  # (C, 1)

    # --- tiny MLP: Linear -> LeakyReLU -> Linear -> LeakyReLU (column form) ---
    h = jnp.dot(w1_ref[...], pooled, preferred_element_type=jnp.float32) + b1_ref[...]
    h = _leaky(h)
    y = jnp.dot(w2_ref[...], h, preferred_element_type=jnp.float32) + b2_ref[...]
    y = _leaky(y).astype(o_ref.dtype)                                           # (C, 1)

    # --- channel gate + final LeakyReLU (self.lin[-1]).  Re-read x_ref so the
    # big tile is not live across the pool/matmuls; VMEM re-reads are cheap. ---
    o_ref[...] = _leaky(x_ref[...] * y)


def global_component(x_nchw, w1, b1, w2, b2):
    """GlobalComponent.forward.

    x_nchw: (B, C, H, W).  w1/w2: (C, C) PyTorch Linear weights (out, in), b: (C,).
    The streamed tensor keeps its input dtype; pool/MLP math runs in float32.
    """
    B, C, H, W = x_nchw.shape
    HW = H * W
    x3 = x_nchw.reshape(B, C, HW)  # HW -> lanes, C -> sublanes

    w1 = jnp.asarray(w1, jnp.float32)
    w2 = jnp.asarray(w2, jnp.float32)
    b1c = jnp.asarray(b1, jnp.float32).reshape(C, 1)
    b2c = jnp.asarray(b2, jnp.float32).reshape(C, 1)

    # VMEM budget: double-buffered input + output streamed tiles + resident weights.
    blk_bytes = C * HW * x3.dtype.itemsize
    weight_bytes = 2 * C * C * 4 + 2 * C * 4
    vmem_limit = int(min(max(32 << 20, 4 * blk_bytes + weight_bytes + (2 << 20)),
                         100 << 20))
    # TODO(synk): for per-batch (C, H*W) blocks beyond ~24 MiB (v7x has only 64 MiB
    # VMEM), switch to an HW-tiled two-pass variant instead of raising the limit.

    def resident(shape):
        # Constant block index -> fetched once, stays VMEM-resident across the grid.
        return pl.BlockSpec(shape, lambda b: (0, 0))

    out = pl.pallas_call(
        global_component_kernel,
        out_shape=jax.ShapeDtypeStruct((B, C, HW), x3.dtype),
        grid=(B,),
        in_specs=[
            pl.BlockSpec((pl.Squeezed(), C, HW), lambda b: (b, 0, 0)),  # x: one batch/step
            resident((C, C)),   # w1
            resident((C, 1)),   # b1
            resident((C, C)),   # w2
            resident((C, 1)),   # b2
        ],
        out_specs=pl.BlockSpec((pl.Squeezed(), C, HW), lambda b: (b, 0, 0)),
        compiler_params=pltpu.CompilerParams(
            dimension_semantics=("parallel",),   # independent per batch; v7x: 2 TCs
            vmem_limit_bytes=vmem_limit,
        ),
    )(x3, w1, b1c, w2, b2c)
    return out.reshape(B, C, H, W)


def _reference(x_nchw, w1, b1, w2, b2):
    """Pure-JAX reference mirroring the PyTorch forward."""
    y = jnp.mean(x_nchw.astype(jnp.float32), axis=(2, 3))          # (B, C)
    y = _leaky(y @ w1.T + b1)
    y = _leaky(y @ w2.T + b2)
    r = x_nchw * y[:, :, None, None].astype(x_nchw.dtype)
    return _leaky(r)


if __name__ == "__main__":
    # Small shapes consistent with the module: n == C (the MLP operates on channels).
    B, C, H, W = 2, 128, 16, 16

    key = jax.random.PRNGKey(0)
    kx, k1, k2, k3, k4 = jax.random.split(key, 5)

    x = jax.random.normal(kx, (B, C, H, W), dtype=jnp.float32)
    bound = 1.0 / jnp.sqrt(C)
    w1 = jax.random.uniform(k1, (C, C), jnp.float32, -bound, bound)   # (out, in)
    b1 = jax.random.uniform(k2, (C,), jnp.float32, -bound, bound)
    w2 = jax.random.uniform(k3, (C, C), jnp.float32, -bound, bound)
    b2 = jax.random.uniform(k4, (C,), jnp.float32, -bound, bound)

    out = jax.block_until_ready(global_component(x, w1, b1, w2, b2))
    ref = jax.block_until_ready(_reference(x, w1, b1, w2, b2))

    assert out.shape == (B, C, H, W)
    assert jnp.allclose(out, ref, atol=1e-4, rtol=1e-4), "mismatch vs reference"
    print("KERNEL_OK")
</pallas_src>

<mosaic_0001>
module attributes {stable_mosaic.version = 11 : i64} {
  func.func @global_component_kernel(%arg0: i32, %arg1: memref<1x128x256xf32, #tpu.memory_space<vmem>>, %arg2: memref<128x128xf32, #tpu.memory_space<vmem>>, %arg3: memref<128x1xf32, #tpu.memory_space<vmem>>, %arg4: memref<128x128xf32, #tpu.memory_space<vmem>>, %arg5: memref<128x1xf32, #tpu.memory_space<vmem>>, %arg6: memref<1x128x256xf32, #tpu.memory_space<vmem>>) attributes {dimension_semantics = [#tpu.dimension_semantics<parallel>], iteration_bounds = array<i64: 2>, scalar_prefetch = 0 : i64, scratch_operands = 0 : i64, tpu.core_type = #tpu.core_type<tc>, window_params = [{transform_indices = @transform_0, window_bounds = array<i64: 1, 128, 256>}, {pipeline_mode = #tpu.pipeline_mode<synchronous>, transform_indices = @transform_1, window_bounds = array<i64: 128, 128>}, {pipeline_mode = #tpu.pipeline_mode<synchronous>, transform_indices = @transform_2, window_bounds = array<i64: 128, 1>}, {pipeline_mode = #tpu.pipeline_mode<synchronous>, transform_indices = @transform_3, window_bounds = array<i64: 128, 128>}, {pipeline_mode = #tpu.pipeline_mode<synchronous>, transform_indices = @transform_4, window_bounds = array<i64: 128, 1>}, {transform_indices = @transform_5, window_bounds = array<i64: 1, 128, 256>}]} {
    %c0 = arith.constant 0 : index
    %c0_0 = arith.constant 0 : index
    %c0_1 = arith.constant 0 : index
    %0 = vector.load %arg1[%c0, %c0_0, %c0_1] : memref<1x128x256xf32, #tpu.memory_space<vmem>>, vector<1x128x256xf32>
    %1 = vector.shape_cast %0 : vector<1x128x256xf32> to vector<128x256xf32>
    %cst = arith.constant dense<0.000000e+00> : vector<128xf32>
    %2 = vector.multi_reduction <add>, %1, %cst [1] : vector<128x256xf32> to vector<128xf32>
    %3 = vector.shape_cast %2 : vector<128xf32> to vector<128x1xf32>
    %cst_2 = arith.constant 2.560000e+02 : f32
    %4 = vector.broadcast %cst_2 : f32 to vector<128x1xf32>
    %5 = arith.divf %3, %4 : vector<128x1xf32>
    %c0_3 = arith.constant 0 : index
    %c0_4 = arith.constant 0 : index
    %6 = vector.load %arg2[%c0_3, %c0_4] : memref<128x128xf32, #tpu.memory_space<vmem>>, vector<128x128xf32>
    %cst_5 = arith.constant dense<0.000000e+00> : vector<128x1xf32>
    %7 = tpu.matmul %6, %5, %cst_5 {dimension_numbers = #tpu.dot_dimension_numbers<[1], [0], [0], [1], [0, 0, 1, 1], [], []>} : vector<128x128xf32>, vector<128x1xf32>, vector<128x1xf32> -> vector<128x1xf32>
    %c0_6 = arith.constant 0 : index
    %c0_7 = arith.constant 0 : index
    %8 = vector.load %arg3[%c0_6, %c0_7] : memref<128x1xf32, #tpu.memory_space<vmem>>, vector<128x1xf32>
    %9 = arith.addf %7, %8 : vector<128x1xf32>
    %cst_8 = arith.constant 0.000000e+00 : f32
    %10 = vector.broadcast %cst_8 : f32 to vector<128x1xf32>
    %11 = arith.cmpf oge, %9, %10 : vector<128x1xf32>
    %cst_9 = arith.constant 0.00999999977 : f32
    %12 = vector.broadcast %cst_9 : f32 to vector<128x1xf32>
    %13 = arith.mulf %12, %9 : vector<128x1xf32>
    %14 = arith.select %11, %9, %13 : vector<128x1xi1>, vector<128x1xf32>
    %c0_10 = arith.constant 0 : index
    %c0_11 = arith.constant 0 : index
    %15 = vector.load %arg4[%c0_10, %c0_11] : memref<128x128xf32, #tpu.memory_space<vmem>>, vector<128x128xf32>
    %cst_12 = arith.constant dense<0.000000e+00> : vector<128x1xf32>
    %16 = tpu.matmul %15, %14, %cst_12 {dimension_numbers = #tpu.dot_dimension_numbers<[1], [0], [0], [1], [0, 0, 1, 1], [], []>} : vector<128x128xf32>, vector<128x1xf32>, vector<128x1xf32> -> vector<128x1xf32>
    %c0_13 = arith.constant 0 : index
    %c0_14 = arith.constant 0 : index
    %17 = vector.load %arg5[%c0_13, %c0_14] : memref<128x1xf32, #tpu.memory_space<vmem>>, vector<128x1xf32>
    %18 = arith.addf %16, %17 : vector<128x1xf32>
    %cst_15 = arith.constant 0.000000e+00 : f32
    %19 = vector.broadcast %cst_15 : f32 to vector<128x1xf32>
    %20 = arith.cmpf oge, %18, %19 : vector<128x1xf32>
    %cst_16 = arith.constant 0.00999999977 : f32
    %21 = vector.broadcast %cst_16 : f32 to vector<128x1xf32>
    %22 = arith.mulf %21, %18 : vector<128x1xf32>
    %23 = arith.select %20, %18, %22 : vector<128x1xi1>, vector<128x1xf32>
    %c0_17 = arith.constant 0 : index
    %c0_18 = arith.constant 0 : index
    %c0_19 = arith.constant 0 : index
    %24 = vector.load %arg1[%c0_17, %c0_18, %c0_19] : memref<1x128x256xf32, #tpu.memory_space<vmem>>, vector<1x128x256xf32>
    %25 = vector.shape_cast %24 : vector<1x128x256xf32> to vector<128x256xf32>
    %26 = vector.broadcast %23 : vector<128x1xf32> to vector<128x256xf32>
    %27 = arith.mulf %25, %26 : vector<128x256xf32>
    %cst_20 = arith.constant 0.000000e+00 : f32
    %28 = vector.broadcast %cst_20 : f32 to vector<128x256xf32>
    %29 = arith.cmpf oge, %27, %28 : vector<128x256xf32>
    %cst_21 = arith.constant 0.00999999977 : f32
    %30 = vector.broadcast %cst_21 : f32 to vector<128x256xf32>
    %31 = arith.mulf %30, %27 : vector<128x256xf32>
    %32 = arith.select %29, %27, %31 : vector<128x256xi1>, vector<128x256xf32>
    %c0_22 = arith.constant 0 : index
    %c0_23 = arith.constant 0 : index
    %c0_24 = arith.constant 0 : index
    %33 = vector.load %arg6[%c0_22, %c0_23, %c0_24] : memref<1x128x256xf32, #tpu.memory_space<vmem>>, vector<1x128x256xf32>
    %34 = vector.shape_cast %33 : vector<1x128x256xf32> to vector<128x256xf32>
    %35 = vector.shape_cast %32 : vector<128x256xf32> to vector<1x128x256xf32>
    tpu.vector_store %arg6[%c0_22, %c0_23, %c0_24], %35 {strides = array<i32>} : memref<1x128x256xf32, #tpu.memory_space<vmem>>, vector<1x128x256xf32>,
    return
  }
  func.func @transform_0(%arg0: i32) -> (i32, i32, i32) {
    %c0_i32 = arith.constant 0 : i32
    %c0_i32_0 = arith.constant 0 : i32
    %c0_i32_1 = arith.constant 0 : i32
    return %arg0, %c0_i32, %c0_i32_0 : i32, i32, i32
  }
  func.func @transform_1(%arg0: i32) -> (i32, i32) {
    %c0_i32 = arith.constant 0 : i32
    %c0_i32_0 = arith.constant 0 : i32
    %c0_i32_1 = arith.constant 0 : i32
    return %c0_i32, %c0_i32_0 : i32, i32
  }
  func.func @transform_2(%arg0: i32) -> (i32, i32) {
    %c0_i32 = arith.constant 0 : i32
    %c0_i32_0 = arith.constant 0 : i32
    %c0_i32_1 = arith.constant 0 : i32
    return %c0_i32, %c0_i32_0 : i32, i32
  }
  func.func @transform_3(%arg0: i32) -> (i32, i32) {
    %c0_i32 = arith.constant 0 : i32
    %c0_i32_0 = arith.constant 0 : i32
    %c0_i32_1 = arith.constant 0 : i32
    return %c0_i32, %c0_i32_0 : i32, i32
  }
  func.func @transform_4(%arg0: i32) -> (i32, i32) {
    %c0_i32 = arith.constant 0 : i32
    %c0_i32_0 = arith.constant 0 : i32
    %c0_i32_1 = arith.constant 0 : i32
    return %c0_i32, %c0_i32_0 : i32, i32
  }
  func.func @transform_5(%arg0: i32) -> (i32, i32, i32) {
    %c0_i32 = arith.constant 0 : i32
    %c0_i32_0 = arith.constant 0 : i32
    %c0_i32_1 = arith.constant 0 : i32
    return %arg0, %c0_i32, %c0_i32_0 : i32, i32, i32
  }
}

</mosaic_0001>

<bundles_post_ra>
// kernel: tpu_custom_call.1
= control target key start
LH: loop header
LB: loop body
LE: loop exit
PB: predicated region body
PF: predicated region fallthrough
CT: control target
= control target key end

     0   :  { %10 = vsyncpa [#allocation3], 0  ;;  %s1709_s0 = inlined_call_operand.hbm [shape: f32[2,128,256], index: 0, kind: input, shape index: {}]   ;;  %s1710_s1 = inlined_call_operand.vmem [shape: f32[128,128], index: 1, kind: input, shape index: {}]   ;;  %s1711_s2 = inlined_call_operand.vmem [shape: f32[128,1], index: 2, kind: input, shape index: {}]   ;;  %s1712_s3 = inlined_call_operand.vmem [shape: f32[128,128], index: 3, kind: input, shape index: {}]   ;;  %s1713_s4 = inlined_call_operand.vmem [shape: f32[128,1], index: 4, kind: input, shape index: {}]   ;;  %s1714_s5 = inlined_call_operand.hbm [shape: f32[2,128,256], index: 5, kind: output, shape index: {}]  }
   0x1   :  { %12 = vsyncpa [#allocation3 + $0x1], 0 }
   0x2   :  { %13 = vsyncpa [#allocation4], 0 }
   0x3   :  { %15 = vsyncpa [#allocation4 + $0x1], 0  ;;  %s1222_s18 = smov 0   ;;  %s1224_s19 = smov 0  }
   0x4   :  { %s1226_s20 = smov 0   ;;  %s1228_s21 = smov 0  }
   0x5 LB: > { %s1243_s22 = sadd.s32 4294967295, %s1184_s21   ;;  %s967_s23 = sadd.s32 4294967294, %s1184_s21   ;;  %s1184_s21 = sphi %s1228_s21, %s1724_s21   ;;  %s1180_s20 = sphi %s1226_s20, %s1723_s20   ;;  %s1176_s19 = sphi %s1224_s19, %s1722_s19   ;;  %s1172_s18 = sphi %s1222_s18, %s1721_s18  }
   0x6   : > { %s1247_s24 = sadd.s32 1, %s1184_s21   ;;  %s28_s25 = sadd.s32 1, %s1180_s20 }
   0x7   : > { %s25_s26 = ssub.s32 %s1184_s21, %s1247_s24  ;;  %p35_p0 = scmp.ne.s32.totalorder %s1180_s20, %s1176_s19 }
   0x8   : > { %p26_p1 = scmp.eq.s32.totalorder %s25_s26, 0  ;;  %p36_p2 = scmp.eq.s32.totalorder %s1184_s21, 0 }
   0x9   : > { %p41_p3 = scmp.ne.s32.totalorder %s1176_s19, %s1172_s18  ;;  %p42_p4 = scmp.eq.s32.totalorder %s1243_s22, 0 }
   0xa   : > { %s1259_s27 = scalar_select %p26_p1, %s1180_s20, %s28_s25  }
   0xb   : > { %p1261_p5 = por %p36_p2, %p35_p0  ;;  %p1265_p6 = por %p42_p4, %p41_p3 }
   0xc   : > { %p149_p7 = scmp.eq.s32.totalorder %s1243_s22, 1  ;;  %p155_p8 = scmp.eq.s32.totalorder %s967_s23, 1 }
   0xd   : > { %p1027_p10 = scmp.lt.s32.totalorder %s1184_s21, 2  ;;  %s187_s7 = sand.u32 1, %s1180_s20  }
   0xe   : > { %p1272_p11 = por %p149_p7, %p35_p0  ;;  %p1276_p12 = por %p155_p8, %p41_p3 }
   0xf   : > { %s981_s8 = sshll.u32 %s1184_s21, 8  ;;  %s970_s9 = sshll.u32 %s187_s7, 8 }
  0x10   : > { %s196_s12 = scalar_lea.hbm %s1709_s0, %s981_s8  ;;  %s191_s14 = scalar_lea.vmem [#allocation2], %s970_s9 }
  0x11   : > { %s197_s13 = sshll.u32 %s196_s12, 4  ;;  %s199_s15 = sshll.u32 %s191_s14, 4  ;;  %s198_s13 = int_to_ptr.hbm [resolvable:$true] %s197_s13  ;;  %s200_s15 = int_to_ptr.vmem [resolvable:$true] %s199_s15 }
  0x12   : > { %p1287_p13 = pnand %p1027_p10, %p1261_p5  ;;  %p973_p0 = scmp.ge.s32.totalorder %s1184_s21, 1 }
  0x13   : > { %p207_p1 = scmp.lt.s32.totalorder %s1184_s21, 3  ;;  %s188_s17 = scalar_lea.sflag [#allocation3], %s187_s7 }
  0x14   : > { %s1088_s23 = sshra.s32 %s198_s13, 4  ;;  %p1092_p3 = pneg %p1287_p13  ;;  %s1089_s23 = int_to_ptr.hbm [resolvable:$true] %s1088_s23 }
  0x15   : > { %s1090_s25 = scalar_lea.hbm %s1089_s23, 256  ;;  %s1095_s28 = scalar_lea.hbm %s1709_s0, 512 }
  0x16   : > { %p1091_p2 = scmp.ne.s32.totalorder %s1089_s23, %s1090_s25  ;;  %p1096_p5 = scmp.lt.s32.totalorder %s1089_s23, %s1709_s0 }
  0x17   : > { %p1097_p8 = scmp.lt.s32.totalorder %s1095_s28, %s1090_s25 }
  0x18   : > { %p1093_p4 = pnand %p1092_p3, %p1091_p2 }
  0x19   : > { %p1098_p10 = por %p1097_p8, %p1096_p5 }
  0x1a   : > { %p1094_p7 = pneg %p1093_p4 }
  0x1c   : > { %p1099_p9 = pnand %p1098_p10, %p1094_p7 }
  0x1e   : > { %1102 = shalt.err (!%p1099_p9)
}
  0x1f   : > { %s1186_s7 = smov 256   ;;  %s1187_s11 = smov 16  }
  0x20   : > { %1022 = dma.hbm_to_vmem [thread:$0]  (!%p1287_p13), %s198_s13, 4096, %s200_s15, %s188_s17, %s1186_s7, %s1186_s7, %s1187_s11  }
  0x21   : > { %p208_p2 = pnand %p973_p0, %p207_p1 }
  0x22   : > { %s1308_s12 = sand.u32 (!%p208_p2), 1, %s1176_s19  }
  0x23   : > { %211 = sbr.rel (%p208_p2) target bundleno = 745 (0x2e9), region = 40  ;;  %s974_s14 = sshll.u32 (!%p208_p2), %s1308_s12, 8 }
  0x24   : > { %s214_s23 = scalar_lea.sflag (!%p208_p2), [#allocation3], %s1308_s12  ;;  %s1314_s25 = scalar_lea.vmem (!%p208_p2), [#allocation2], %s974_s14 }
  0x28   : > { %1163 = dma.done.wait (%p1265_p6), %s214_s23, 4096  }
  0x29   : > { %1165 = vsyncadd (%p1265_p6), %s214_s23, 4294963200  ;;  %v275_v0 = vld [vmem:[%s1314_s25 + $0xf0] sm:$0xff]  ;;  %v276_v1 = vld [vmem:[%s1314_s25 + $0xf8] sm:$0xff]  ;;  %v1188_v48 = vmov 256.0   ;;  %s1611_s11 = scalar_lea.vmem [#allocation5], %s974_s14  ;;  %s982_s14 = sshll.u32 %s1243_s22, 8 }
  0x2a   : > { %v271_v2 = vld [vmem:[%s1314_s25 + $0xd0] sm:$0xff]  ;;  %v322_v3 = vadd.f32 %v276_v1, %v275_v0  ;;  %v272_v4 = vld [vmem:[%s1314_s25 + $0xd8] sm:$0xff]  ;;  %v273_v9 = vld [vmem:[%s1314_s25 + $0xe0] sm:$0xff]  ;;  %1070 = vrcp.f32 %v1188_v48  ;;  %s890_s13 = scalar_lea.hbm %s1714_s5, %s982_s14  ;;  %s891_s22 = sshll.u32 %s1611_s11, 4  ;;  %s892_s22 = int_to_ptr.vmem [resolvable:$true] %s891_s22 }
  0x2b   : > { %v267_v5 = vld [vmem:[%s1314_s25 + $0xb0] sm:$0xff]  ;;  %v268_v6 = vld [vmem:[%s1314_s25 + $0xb8] sm:$0xff]  ;;  %v316_v7 = vadd.f32 %v272_v4, %v271_v2  ;;  %v274_v10 = vld [vmem:[%s1314_s25 + $0xe8] sm:$0xff]  ;;  %s893_s15 = sshll.u32 %s890_s13, 4  ;;  %s879_s16 = scalar_lea.sflag [#allocation4], %s1308_s12  ;;  %s894_s15 = int_to_ptr.hbm [resolvable:$true] %s893_s15 }
  0x2c   : > { %v310_v8 = vadd.f32 %v268_v6, %v267_v5  ;;  %323 = vadd.xlane.f32.xlu0 %v322_v3  ;;  %v269_v11 = vld [vmem:[%s1314_s25 + $0xc0] sm:$0xff]  ;;  %v270_v12 = vld [vmem:[%s1314_s25 + $0xc8] sm:$0xff]  ;;  %v319_v15 = vadd.f32 %v274_v10, %v273_v9  ;;  %v1339_v18 = vld [vmem:[%s1314_s25 + $0x90] sm:$0xff]  ;;  %s1132_s17 = sshra.s32 %s894_s15, 4  ;;  %s1138_s28 = scalar_lea.hbm %s1714_s5, 512  ;;  %s1133_s17 = int_to_ptr.hbm [resolvable:$true] %s1132_s17 }
  0x2d   : > { %317 = vadd.xlane.f32.xlu1 %v316_v7  ;;  %v1331_v13 = vld [vmem:[%s1314_s25 + $0xa0] sm:$0xff]  ;;  %v1334_v14 = vld [vmem:[%s1314_s25 + $0xa8] sm:$0xff]  ;;  %v313_v16 = vadd.f32 %v270_v12, %v269_v11  ;;  %v1342_v19 = vld [vmem:[%s1314_s25 + $0x98] sm:$0xff]  ;;  %s1134_s26 = scalar_lea.hbm %s1133_s17, 256  ;;  %p1139_p0 = scmp.lt.s32.totalorder %s1133_s17, %s1714_s5 }
  0x2e   : > { %311 = vadd.xlane.f32.xlu2 %v310_v8  ;;  %v307_v17 = vadd.f32 %v1334_v14, %v1331_v13  ;;  %v1345_v20 = vld [vmem:[%s1314_s25 + $0x80] sm:$0xff]  ;;  %v1348_v21 = vld [vmem:[%s1314_s25 + $0x88] sm:$0xff]  ;;  %v259_v22 = vld [vmem:[%s1314_s25 + $0x70] sm:$0xff]  ;;  %v304_v24 = vadd.f32 %v1342_v19, %v1339_v18  ;;  %p1135_p6 = scmp.ne.s32.totalorder %s1133_s17, %s1134_s26  ;;  %p1140_p1 = scmp.lt.s32.totalorder %s1138_s28, %s1134_s26 }
  0x2f   : > { %v260_v23 = vld [vmem:[%s1314_s25 + $0x78] sm:$0xff]  ;;  %v301_v25 = vadd.f32 %v1348_v21, %v1345_v20  ;;  %v257_v27 = vld [vmem:[%s1314_s25 + $0x60] sm:$0xff]  ;;  %v258_v28 = vld [vmem:[%s1314_s25 + $0x68] sm:$0xff] }
  0x30   : > { %v298_v26 = vadd.f32 %v260_v23, %v259_v22  ;;  %v1359_v29 = vld [vmem:[%s1314_s25 + $0x50] sm:$0xff]  ;;  %v1362_v30 = vld [vmem:[%s1314_s25 + $0x58] sm:$0xff]  ;;  %v253_v31 = vld [vmem:[%s1314_s25 + $0x40] sm:$0xff]  ;;  %v295_v33 = vadd.f32 %v258_v28, %v257_v27  ;;  %v1071_v49 = vpop.eup %1070  ;;  %p1136_p9 = pnand %p1135_p6, %p1272_p11  ;;  %p1141_p3 = por %p1140_p1, %p1139_p0 }
  0x31   : > { %v254_v32 = vld [vmem:[%s1314_s25 + $0x48] sm:$0xff]  ;;  %v292_v34 = vadd.f32 %v1362_v30, %v1359_v29  ;;  %v1369_v36 = vld [vmem:[%s1314_s25 + $0x30] sm:$0xff]  ;;  %v1372_v37 = vld [vmem:[%s1314_s25 + $0x38] sm:$0xff]  ;;  %v326_v50 = vmul.f32 256.0, %v1071_v49  ;;  %vm330_vm0 = vweird.f32 %v1071_v49 }
  0x32   : > { %v289_v35 = vadd.f32 %v254_v32, %v253_v31  ;;  %v1375_v38 = vld [vmem:[%s1314_s25 + $0x20] sm:$0xff]  ;;  %v1378_v39 = vld [vmem:[%s1314_s25 + $0x28] sm:$0xff]  ;;  %v1381_v40 = vld [vmem:[%s1314_s25 + $0x10] sm:$0xff]  ;;  %v286_v42 = vadd.f32 %v1372_v37, %v1369_v36  ;;  %p1137_p13 = pneg %p1136_p9 }
  0x33   : > { %v1384_v41 = vld [vmem:[%s1314_s25 + $0x18] sm:$0xff]  ;;  %v283_v43 = vadd.f32 %v1378_v39, %v1375_v38  ;;  %v1393_v45 = vld [vmem:[%s1314_s25] sm:$0xff]  ;;  %v1396_v46 = vld [vmem:[%s1314_s25 + $0x8] sm:$0xff]  ;;  %v327_v51 = vsub.f32 1.0, %v326_v50 }
  0x34   : > { %320 = vadd.xlane.f32.xlu0 %v319_v15  ;;  %v280_v44 = vadd.f32 %v1384_v41, %v1381_v40  ;;  %v277_v47 = vadd.f32 %v1396_v46, %v1393_v45  ;;  %v356_v31 = vld [vmem:[%s1710_s1 + $0x40] sm:$0xff]  ;;  %v353_v50 = vld [vmem:[%s1710_s1 + $0x28] sm:$0xff]  ;;  %p1142_p4 = pnand %p1141_p3, %p1137_p13 }
  0x35   : > { %314 = vadd.xlane.f32.xlu1 %v313_v16  ;;  %v328_v52 = vmul.f32 %v1071_v49, %v327_v51  ;;  %v348_v32 = vld [vmem:[%s1710_s1] sm:$0xff]  ;;  %v362_v51 = vld [vmem:[%s1710_s1 + $0x70] sm:$0xff] }
  0x36   : > { %308 = vadd.xlane.f32.xlu2 %v307_v17  ;;  %v352_v48 = vld [vmem:[%s1710_s1 + $0x20] sm:$0xff] }
  0x37   : > { %v329_v53 = vadd.f32 %v1071_v49, %v328_v52  ;;  %v354_v52 = vld [vmem:[%s1710_s1 + $0x30] sm:$0xff] }
  0x39   : > { %v331_v54 = vsel %vm330_vm0, %v1071_v49, %v329_v53  ;;  %v361_v49 = vld [vmem:[%s1710_s1 + $0x68] sm:$0xff]  ;;  %v363_v53 = vld [vmem:[%s1710_s1 + $0x78] sm:$0xff] }
  0x3c   : > { %305 = vadd.xlane.f32.xlu0 %v304_v24 }
  0x3d   : > { %302 = vadd.xlane.f32.xlu1 %v301_v25 }
  0x3e   : > { %299 = vadd.xlane.f32.xlu2 %v298_v26 }
  0x44   : > { %296 = vadd.xlane.f32.xlu0 %v295_v33  ;;  %v357_v33 = vld [vmem:[%s1710_s1 + $0x48] sm:$0xff] }
  0x45   : > { %293 = vadd.xlane.f32.xlu1 %v292_v34  ;;  %v349_v34 = vld [vmem:[%s1710_s1 + $0x8] sm:$0xff] }
  0x46   : > { %290 = vadd.xlane.f32.xlu2 %v289_v35  ;;  %v358_v35 = vld [vmem:[%s1710_s1 + $0x50] sm:$0xff] }
  0x4c   : > { %287 = vadd.xlane.f32.xlu0 %v286_v42  ;;  %v350_v42 = vld [vmem:[%s1710_s1 + $0x10] sm:$0xff] }
  0x4d   : > { %284 = vadd.xlane.f32.xlu1 %v283_v43  ;;  %v359_v43 = vld [vmem:[%s1710_s1 + $0x58] sm:$0xff] }
  0x4e   : > { %281 = vadd.xlane.f32.xlu2 %v280_v44  ;;  %v351_v44 = vld [vmem:[%s1710_s1 + $0x18] sm:$0xff] }
  0x54   : > { %278 = vadd.xlane.f32.xlu0 %v277_v47  ;;  %v360_v47 = vld [vmem:[%s1710_s1 + $0x60] sm:$0xff] }
  0x9f   : > { %v324_v55 = vpop.xlane.xlu0 %323 }
  0xa0   : > { %v347_v56 = vmul.f32 %v331_v54, %v324_v55  ;;  %v318_v57 = vpop.xlane.xlu1 %317 }
  0xa1   : > { %v312_v58 = vpop.xlane.xlu2 %311  ;;  %v345_v63 = vmul.f32 %v331_v54, %v318_v57 }
  0xa2   : > { %380 = vmatpush.msra.mxu0 %v347_v56  ;;  %983 = vmatpush.msra.mxu2 %v347_v56  ;;  %v343_v1 = vmul.f32 %v331_v54, %v312_v58 }
  0xa7   : > { %v321_v59 = vpop.xlane.xlu0 %320 }
  0xa8   : > { %v346_v60 = vmul.f32 %v331_v54, %v321_v59  ;;  %v315_v61 = vpop.xlane.xlu1 %314 }
  0xa9   : > { %v309_v62 = vpop.xlane.xlu2 %308  ;;  %v344_v0 = vmul.f32 %v331_v54, %v315_v61 }
  0xaa   : > { %381 = vmatpush.msra.mxu0 %v346_v60  ;;  %984 = vmatpush.msra.mxu2 %v346_v60  ;;  %v342_v3 = vmul.f32 %v331_v54, %v309_v62 }
  0xac   : > { %382 = vmatpush.msra.mxu0 %v345_v63  ;;  %985 = vmatpush.msra.mxu2 %v345_v63 }
  0xae   : > { %383 = vmatpush.msra.mxu0 %v344_v0  ;;  %986 = vmatpush.msra.mxu2 %v344_v0 }
  0xaf   : > { %v306_v2 = vpop.xlane.xlu0 %305 }
  0xb0   : > { %384 = vmatpush.msra.mxu0 %v343_v1  ;;  %987 = vmatpush.msra.mxu2 %v343_v1  ;;  %v303_v4 = vpop.xlane.xlu1 %302  ;;  %v341_v6 = vmul.f32 %v331_v54, %v306_v2 }
  0xb1   : > { %v300_v5 = vpop.xlane.xlu2 %299  ;;  %v340_v7 = vmul.f32 %v331_v54, %v303_v4  ;;  %v378_v4 = vld [vmem:[%s1711_s2 + $0x70] sm:$0xff] }
  0xb2   : > { %385 = vmatpush.msra.mxu0 %v342_v3  ;;  %988 = vmatpush.msra.mxu2 %v342_v3  ;;  %v339_v8 = vmul.f32 %v331_v54, %v300_v5  ;;  %v377_v5 = vld [vmem:[%s1711_s2 + $0x68] sm:$0xff] }
  0xb4   : > { %386 = vmatpush.msra.mxu0 %v341_v6  ;;  %989 = vmatpush.msra.mxu2 %v341_v6  ;;  %v379_v6 = vld [vmem:[%s1711_s2 + $0x78] sm:$0xff] }
  0xb6   : > { %387 = vmatpush.msra.mxu0 %v340_v7  ;;  %990 = vmatpush.msra.mxu2 %v340_v7 }
  0xb7   : > { %v297_v9 = vpop.xlane.xlu0 %296 }
  0xb8   : > { %v338_v10 = vmul.f32 %v331_v54, %v297_v9  ;;  %388 = vmatpush.msra.mxu0 %v339_v8  ;;  %991 = vmatpush.msra.mxu2 %v339_v8  ;;  %v294_v11 = vpop.xlane.xlu1 %293  ;;  %v376_v8 = vld [vmem:[%s1711_s2 + $0x60] sm:$0xff] }
  0xb9   : > { %v291_v12 = vpop.xlane.xlu2 %290  ;;  %v337_v15 = vmul.f32 %v331_v54, %v294_v11 }
  0xba   : > { %389 = vmatpush.msra.mxu0 %v338_v10  ;;  %992 = vmatpush.msra.mxu2 %v338_v10  ;;  %v336_v16 = vmul.f32 %v331_v54, %v291_v12 }
  0xbc   : > { %390 = vmatpush.msra.mxu0 %v337_v15  ;;  %993 = vmatpush.msra.mxu2 %v337_v15  ;;  %v375_v15 = vld [vmem:[%s1711_s2 + $0x58] sm:$0xff] }
  0xbe   : > { %391 = vmatpush.msra.mxu0 %v336_v16  ;;  %994 = vmatpush.msra.mxu2 %v336_v16 }
  0xbf   : > { %v288_v17 = vpop.xlane.xlu0 %287 }
  0xc0   : > { %v335_v22 = vmul.f32 %v331_v54, %v288_v17  ;;  %v285_v23 = vpop.xlane.xlu1 %284 }
  0xc1   : > { %v282_v24 = vpop.xlane.xlu2 %281  ;;  %v334_v25 = vmul.f32 %v331_v54, %v285_v23  ;;  %v374_v23 = vld [vmem:[%s1711_s2 + $0x50] sm:$0xff] }
  0xc2   : > { %392 = vmatpush.msra.mxu0 %v335_v22  ;;  %995 = vmatpush.msra.mxu2 %v335_v22  ;;  %v333_v26 = vmul.f32 %v331_v54, %v282_v24 }
  0xc4   : > { %393 = vmatpush.msra.mxu0 %v334_v25  ;;  %996 = vmatpush.msra.mxu2 %v334_v25 }
  0xc6   : > { %394 = vmatpush.msra.mxu0 %v333_v26  ;;  %997 = vmatpush.msra.mxu2 %v333_v26 }
  0xc7   : > { %v279_v27 = vpop.xlane.xlu0 %278 }
  0xc8   : > { %v332_v28 = vmul.f32 %v331_v54, %v279_v27  ;;  %v355_v54 = vld [vmem:[%s1710_s1 + $0x38] sm:$0xff]  ;;  %v373_v27 = vld [vmem:[%s1711_s2 + $0x48] sm:$0xff] }
  0xca   : > { %395 = vmatpush.msra.mxu0 %v332_v28  ;;  %998 = vmatpush.msra.mxu2 %v332_v28 }
  0xcb   : > { %420 = vmatmul.f32.vlgmr.msra.gmra.mxu2 %v356_v31  ;;  %396 = vmatmul.f32.vlgmr.msra.gmra.mxu0 %v348_v32 }
  0xd3   : > { %423 = vmatmul.f32.gmra.mxu2 %v357_v33  ;;  %399 = vmatmul.f32.gmra.mxu0 %v349_v34  ;;  %v372_v33 = vld [vmem:[%s1711_s2 + $0x40] sm:$0xff] }
  0xdb   : > { %426 = vmatmul.f32.gmra.mxu2 %v358_v35  ;;  %402 = vmatmul.f32.gmra.mxu0 %v350_v42 }
  0xe3   : > { %429 = vmatmul.f32.gmra.mxu2 %v359_v43  ;;  %405 = vmatmul.f32.gmra.mxu0 %v351_v44  ;;  %v371_v43 = vld [vmem:[%s1711_s2 + $0x38] sm:$0xff] }
  0xeb   : > { %432 = vmatmul.f32.gmra.mxu2 %v360_v47  ;;  %408 = vmatmul.f32.gmra.mxu0 %v352_v48 }
  0xf3   : > { %435 = vmatmul.f32.gmra.mxu2 %v361_v49  ;;  %411 = vmatmul.f32.gmra.mxu0 %v353_v50  ;;  %v370_v50 = vld [vmem:[%s1711_s2 + $0x30] sm:$0xff] }
  0xfb   : > { %438 = vmatmul.f32.gmra.mxu2 %v362_v51  ;;  %414 = vmatmul.f32.gmra.mxu0 %v354_v52 }
 0x103   : > { %441 = vmatmul.f32.gmra.mxu2 %v363_v53  ;;  %417 = vmatmul.f32.gmra.mxu0 %v355_v54  ;;  %v369_v54 = vld [vmem:[%s1711_s2 + $0x28] sm:$0xff] }
 0x148   : > { %v1448_v55 = vpop.f32.mrf.mxu0 }
 0x14e   : > { %v421_v56 = vpop.f32.mrf.mxu2 }
 0x14f   : > { %v422_v47 = vadd.f32 %v421_v56, %v372_v33  ;;  %v494_v33 = vld [vmem:[%s1712_s3 + $0x8] sm:$0xff] }
 0x150   : > { %v1450_v57 = vpop.f32.mrf.mxu0 }
 0x151   : > { %vm453_vm8 = vcmp.ge.f32.partialorder %v422_v47, 0.0 }
 0x156   : > { %v424_v58 = vpop.f32.mrf.mxu2 }
 0x157   : > { %v425_v34 = vadd.f32 %v424_v58, %v373_v27 }
 0x158   : > { %v1452_v60 = vpop.f32.mrf.mxu0 }
 0x159   : > { %v470_v53 = vmul.f32 0.01, %v425_v34  ;;  %vm454_vm7 = vcmp.ge.f32.partialorder %v425_v34, 0.0 }
 0x15e   : > { %v427_v59 = vpop.f32.mrf.mxu2 }
 0x15f   : > { %v428_v28 = vadd.f32 %v427_v59, %v374_v23  ;;  %v469_v59 = vmul.f32 0.01, %v422_v47 }
 0x160   : > { %v1454_v62 = vpop.f32.mrf.mxu0 }
 0x161   : > { %v471_v49 = vmul.f32 0.01, %v428_v28  ;;  %vm455_vm6 = vcmp.ge.f32.partialorder %v428_v28, 0.0 }
 0x163   : > { %v487_v58 = vsel %vm455_vm6, %v428_v28, %v471_v49  ;;  %v498_v49 = vld [vmem:[%s1712_s3 + $0x28] sm:$0xff] }
 0x166   : > { %v430_v61 = vpop.f32.mrf.mxu2 }
 0x167   : > { %v431_v24 = vadd.f32 %v430_v61, %v375_v15  ;;  %v368_v61 = vld [vmem:[%s1711_s2 + $0x20] sm:$0xff] }
 0x168   : > { %v1456_v0 = vpop.f32.mrf.mxu0 }
 0x169   : > { %v472_v42 = vmul.f32 0.01, %v431_v24  ;;  %vm456_vm5 = vcmp.ge.f32.partialorder %v431_v24, 0.0 }
 0x16b   : > { %v488_v52 = vsel %vm456_vm5, %v431_v24, %v472_v42  ;;  %v503_v42 = vld [vmem:[%s1712_s3 + $0x50] sm:$0xff] }
 0x16e   : > { %v433_v63 = vpop.f32.mrf.mxu2 }
 0x16f   : > { %v434_v16 = vadd.f32 %v433_v63, %v376_v8  ;;  %v366_v8 = vld [vmem:[%s1711_s2 + $0x10] sm:$0xff] }
 0x170   : > { %v412_v2 = vpop.f32.mrf.mxu0 }
 0x171   : > { %v473_v32 = vmul.f32 0.01, %v434_v16  ;;  %vm457_vm4 = vcmp.ge.f32.partialorder %v434_v16, 0.0  ;;  %v413_v63 = vadd.f32 %v412_v2, %v369_v54  ;;  %v508_v54 = vld [vmem:[%s1712_s3 + $0x78] sm:$0xff] }
 0x173   : > { %v489_v48 = vsel %vm457_vm4, %v434_v16, %v473_v32  ;;  %vm450_vm11 = vcmp.ge.f32.partialorder %v413_v63, 0.0  ;;  %v364_v16 = vld [vmem:[%s1711_s2] sm:$0xff] }
 0x174   : > { %v398_v23 = vadd.f32 %v1448_v55, %v364_v16  ;;  %v493_v55 = vld [vmem:[%s1712_s3] sm:$0xff]  ;;  %v511_v16 = vld [vmem:[%s1713_s4 + $0x10] sm:$0xff] }
 0x176   : > { %v436_v1 = vpop.f32.mrf.mxu2  ;;  %v461_v28 = vmul.f32 0.01, %v398_v23  ;;  %vm445_vm0 = vcmp.ge.f32.partialorder %v398_v23, 0.0 }
 0x177   : > { %v437_v11 = vadd.f32 %v436_v1, %v377_v5  ;;  %v486_v1 = vsel %vm454_vm7, %v425_v34, %v470_v53  ;;  %v410_v5 = vadd.f32 %v1456_v0, %v368_v61  ;;  %v404_v0 = vadd.f32 %v1452_v60, %v366_v8  ;;  %v502_v34 = vld [vmem:[%s1712_s3 + $0x48] sm:$0xff]  ;;  %v500_v53 = vld [vmem:[%s1712_s3 + $0x38] sm:$0xff] }
 0x178   : > { %v415_v10 = vpop.f32.mrf.mxu0  ;;  %v477_v32 = vsel %vm445_vm0, %v398_v23, %v461_v28 }
 0x179   : > { %v474_v26 = vmul.f32 0.01, %v437_v11  ;;  %vm458_vm3 = vcmp.ge.f32.partialorder %v437_v11, 0.0  ;;  %v416_v56 = vadd.f32 %v415_v10, %v370_v50  ;;  %v466_v10 = vmul.f32 0.01, %v413_v63  ;;  %v506_v50 = vld [vmem:[%s1712_s3 + $0x68] sm:$0xff] }
 0x17a   : > { %v465_v15 = vmul.f32 0.01, %v410_v5  ;;  %vm449_vm12 = vcmp.ge.f32.partialorder %v410_v5, 0.0  ;;  %v463_v60 = vmul.f32 0.01, %v404_v0  ;;  %vm447_vm14 = vcmp.ge.f32.partialorder %v404_v0, 0.0 }
 0x17b   : > { %v490_v35 = vsel %vm458_vm3, %v437_v11, %v474_v26  ;;  %vm451_vm10 = vcmp.ge.f32.partialorder %v416_v56, 0.0  ;;  %v365_v11 = vld [vmem:[%s1711_s2 + $0x8] sm:$0xff] }
 0x17c   : > { %v481_v24 = vsel %vm449_vm12, %v410_v5, %v465_v15  ;;  %v479_v27 = vsel %vm447_vm14, %v404_v0, %v463_v60  ;;  %v510_v5 = vld [vmem:[%s1713_s4 + $0x8] sm:$0xff] }
 0x17e   : > { %v439_v3 = vpop.f32.mrf.mxu2 }
 0x17f   : > { %v440_v7 = vadd.f32 %v439_v3, %v378_v4  ;;  %v367_v4 = vld [vmem:[%s1711_s2 + $0x18] sm:$0xff] }
 0x180   : > { %v418_v44 = vpop.f32.mrf.mxu0  ;;  %v407_v2 = vadd.f32 %v1454_v62, %v367_v4  ;;  %v401_v62 = vadd.f32 %v1450_v57, %v365_v11 }
 0x181   : > { %v475_v22 = vmul.f32 0.01, %v440_v7  ;;  %vm459_vm2 = vcmp.ge.f32.partialorder %v440_v7, 0.0  ;;  %v419_v51 = vadd.f32 %v418_v44, %v371_v43  ;;  %v496_v43 = vld [vmem:[%s1712_s3 + $0x18] sm:$0xff] }
 0x182   : > { %vm448_vm13 = vcmp.ge.f32.partialorder %v407_v2, 0.0  ;;  %v462_v26 = vmul.f32 0.01, %v401_v62  ;;  %vm446_vm15 = vcmp.ge.f32.partialorder %v401_v62, 0.0  ;;  %v504_v44 = vld [vmem:[%s1712_s3 + $0x58] sm:$0xff] }
 0x183   : > { %v491_v31 = vsel %vm459_vm2, %v440_v7, %v475_v22  ;;  %v468_v3 = vmul.f32 0.01, %v419_v51  ;;  %vm452_vm9 = vcmp.ge.f32.partialorder %v419_v51, 0.0  ;;  %v467_v7 = vmul.f32 0.01, %v416_v56 }
 0x184   : > { %v464_v22 = vmul.f32 0.01, %v407_v2  ;;  %v478_v57 = vsel %vm446_vm15, %v401_v62, %v462_v26 }
 0x186   : > { %v442_v9 = vpop.f32.mrf.mxu2 }
 0x187   : > { %v443_v12 = vadd.f32 %v442_v9, %v379_v6  ;;  %v485_v6 = vsel %vm453_vm8, %v422_v47, %v469_v59  ;;  %v484_v9 = vsel %vm452_vm9, %v419_v51, %v468_v3  ;;  %v497_v47 = vld [vmem:[%s1712_s3 + $0x20] sm:$0xff]  ;;  %v499_v51 = vld [vmem:[%s1712_s3 + $0x30] sm:$0xff] }
 0x189   : > { %vm460_vm1 = vcmp.ge.f32.partialorder %v443_v12, 0.0  ;;  %v476_v17 = vmul.f32 0.01, %v443_v12 }
 0x18b   : > { %v492_v25 = vsel %vm460_vm1, %v443_v12, %v476_v17  ;;  %v483_v12 = vsel %vm451_vm10, %v416_v56, %v467_v7  ;;  %v482_v17 = vsel %vm450_vm11, %v413_v63, %v466_v10  ;;  %v1189_v56 = vmov 0   ;;  %v518_v10 = vld [vmem:[%s1713_s4 + $0x48] sm:$0xff] }
 0x18c   : > { %525 = vmatpush.msra.mxu1 %v492_v25  ;;  %999 = vmatpush.msra.mxu3 %v492_v25  ;;  %v480_v25 = vsel %vm448_vm13, %v407_v2, %v464_v22 }
 0x18d   : > { %1067 = vset.pattern.permute.xlu1 %v1189_v56  ;;  %1068 = vset.pattern.permute.xlu2 %v1189_v56 }
 0x18e   : > { %526 = vmatpush.msra.mxu1 %v491_v31  ;;  %1000 = vmatpush.msra.mxu3 %v491_v31  ;;  %v501_v31 = vld [vmem:[%s1712_s3 + $0x40] sm:$0xff] }
 0x18f   : > { %1069 = vset.pattern.permute.xlu0 %v1189_v56 }
 0x190   : > { %527 = vmatpush.msra.mxu1 %v490_v35  ;;  %1001 = vmatpush.msra.mxu3 %v490_v35  ;;  %v495_v35 = vld [vmem:[%s1712_s3 + $0x10] sm:$0xff] }
 0x192   : > { %528 = vmatpush.msra.mxu1 %v489_v48  ;;  %1002 = vmatpush.msra.mxu3 %v489_v48  ;;  %v505_v48 = vld [vmem:[%s1712_s3 + $0x60] sm:$0xff] }
 0x194   : > { %529 = vmatpush.msra.mxu1 %v488_v52  ;;  %1003 = vmatpush.msra.mxu3 %v488_v52  ;;  %v507_v52 = vld [vmem:[%s1712_s3 + $0x70] sm:$0xff] }
 0x196   : > { %530 = vmatpush.msra.mxu1 %v487_v58  ;;  %1004 = vmatpush.msra.mxu3 %v487_v58  ;;  %v509_v58 = vld [vmem:[%s1713_s4] sm:$0xff] }
 0x198   : > { %531 = vmatpush.msra.mxu1 %v486_v1  ;;  %1005 = vmatpush.msra.mxu3 %v486_v1  ;;  %v517_v1 = vld [vmem:[%s1713_s4 + $0x40] sm:$0xff] }
 0x19a   : > { %532 = vmatpush.msra.mxu1 %v485_v6  ;;  %1006 = vmatpush.msra.mxu3 %v485_v6 }
 0x19c   : > { %533 = vmatpush.msra.mxu1 %v484_v9  ;;  %1007 = vmatpush.msra.mxu3 %v484_v9 }
 0x19e   : > { %534 = vmatpush.msra.mxu1 %v483_v12  ;;  %1008 = vmatpush.msra.mxu3 %v483_v12 }
 0x1a0   : > { %535 = vmatpush.msra.mxu1 %v482_v17  ;;  %1009 = vmatpush.msra.mxu3 %v482_v17 }
 0x1a2   : > { %536 = vmatpush.msra.mxu1 %v481_v24  ;;  %1010 = vmatpush.msra.mxu3 %v481_v24  ;;  %v519_v24 = vld [vmem:[%s1713_s4 + $0x50] sm:$0xff] }
 0x1a4   : > { %537 = vmatpush.msra.mxu1 %v480_v25  ;;  %1011 = vmatpush.msra.mxu3 %v480_v25 }
 0x1a6   : > { %538 = vmatpush.msra.mxu1 %v479_v27  ;;  %1012 = vmatpush.msra.mxu3 %v479_v27  ;;  %v512_v27 = vld [vmem:[%s1713_s4 + $0x18] sm:$0xff] }
 0x1a8   : > { %539 = vmatpush.msra.mxu1 %v478_v57  ;;  %1013 = vmatpush.msra.mxu3 %v478_v57 }
 0x1aa   : > { %540 = vmatpush.msra.mxu1 %v477_v32  ;;  %1014 = vmatpush.msra.mxu3 %v477_v32 }
 0x1ab   : > { %541 = vmatmul.f32.vlgmr.msra.gmra.mxu1 %v493_v55  ;;  %565 = vmatmul.f32.vlgmr.msra.gmra.mxu3 %v501_v31 }
 0x1b3   : > { %544 = vmatmul.f32.gmra.mxu1 %v494_v33  ;;  %568 = vmatmul.f32.gmra.mxu3 %v502_v34  ;;  %v520_v33 = vld [vmem:[%s1713_s4 + $0x58] sm:$0xff] }
 0x1bb   : > { %547 = vmatmul.f32.gmra.mxu1 %v495_v35  ;;  %571 = vmatmul.f32.gmra.mxu3 %v503_v42 }
 0x1c3   : > { %550 = vmatmul.f32.gmra.mxu1 %v496_v43  ;;  %574 = vmatmul.f32.gmra.mxu3 %v504_v44  ;;  %v513_v43 = vld [vmem:[%s1713_s4 + $0x20] sm:$0xff] }
 0x1cb   : > { %553 = vmatmul.f32.gmra.mxu1 %v497_v47  ;;  %577 = vmatmul.f32.gmra.mxu3 %v505_v48 }
 0x1d3   : > { %556 = vmatmul.f32.gmra.mxu1 %v498_v49  ;;  %580 = vmatmul.f32.gmra.mxu3 %v506_v50 }
 0x1db   : > { %559 = vmatmul.f32.gmra.mxu1 %v499_v51  ;;  %583 = vmatmul.f32.gmra.mxu3 %v507_v52  ;;  %v521_v51 = vld [vmem:[%s1713_s4 + $0x60] sm:$0xff] }
 0x1e3   : > { %562 = vmatmul.f32.gmra.mxu1 %v500_v53  ;;  %586 = vmatmul.f32.gmra.mxu3 %v508_v54  ;;  %v514_v53 = vld [vmem:[%s1713_s4 + $0x28] sm:$0xff] }
 0x228   : > { %v542_v59 = vpop.f32.mrf.mxu1 }
 0x229   : > { %v543_v61 = vadd.f32 %v542_v59, %v509_v58 }
 0x22b   : > { %v606_v63 = vmul.f32 0.01, %v543_v61  ;;  %vm590_vm1 = vcmp.ge.f32.partialorder %v543_v61, 0.0 }
 0x22d   : > { %v622_v3 = vsel %vm590_vm1, %v543_v61, %v606_v63 }
 0x22e   : > { %v566_v4 = vpop.f32.mrf.mxu3  ;;  %640 = vperm.xlu1 %1067, %v622_v3  }
 0x22f   : > { %v567_v6 = vadd.f32 %v566_v4, %v517_v1 }
 0x230   : > { %v545_v7 = vpop.f32.mrf.mxu1 }
 0x231   : > { %v614_v8 = vmul.f32 0.01, %v567_v6  ;;  %v546_v2 = vadd.f32 %v545_v7, %v510_v5  ;;  %vm598_vm2 = vcmp.ge.f32.partialorder %v567_v6, 0.0 }
 0x233   : > { %v607_v9 = vmul.f32 0.01, %v546_v2  ;;  %vm591_vm3 = vcmp.ge.f32.partialorder %v546_v2, 0.0  ;;  %v630_v11 = vsel %vm598_vm2, %v567_v6, %v614_v8  ;;  %v515_v6 = vld [vmem:[%s1713_s4 + $0x30] sm:$0xff] }
 0x235   : > { %v623_v0 = vsel %vm591_vm3, %v546_v2, %v607_v9  ;;  %v523_v9 = vld [vmem:[%s1713_s4 + $0x70] sm:$0xff] }
 0x236   : > { %v569_v12 = vpop.f32.mrf.mxu3  ;;  %680 = vperm.xlu1 %1067, %v630_v11   ;;  %645 = vperm.xlu2 %1068, %v623_v0   ;;  %v516_v0 = vld [vmem:[%s1713_s4 + $0x38] sm:$0xff] }
 0x237   : > { %v570_v15 = vadd.f32 %v569_v12, %v518_v10 }
 0x238   : > { %v548_v62 = vpop.f32.mrf.mxu1 }
 0x239   : > { %v615_v17 = vmul.f32 0.01, %v570_v15  ;;  %vm599_vm4 = vcmp.ge.f32.partialorder %v570_v15, 0.0  ;;  %v549_v22 = vadd.f32 %v548_v62, %v511_v16 }
 0x23b   : > { %v631_v23 = vsel %vm599_vm4, %v570_v15, %v615_v17  ;;  %v608_v25 = vmul.f32 0.01, %v549_v22  ;;  %vm592_vm5 = vcmp.ge.f32.partialorder %v549_v22, 0.0  ;;  %v522_v17 = vld [vmem:[%s1713_s4 + $0x68] sm:$0xff] }
 0x23c   : > { %685 = vperm.xlu0 %1069, %v631_v23   ;;  %v524_v23 = vld [vmem:[%s1713_s4 + $0x78] sm:$0xff] }
 0x23d   : > { %v624_v31 = vsel %vm592_vm5, %v549_v22, %v608_v25 }
 0x23e   : > { %v572_v60 = vpop.f32.mrf.mxu3 }
 0x23f   : > { %v573_v26 = vadd.f32 %v572_v60, %v519_v24 }
 0x240   : > { %v551_v28 = vpop.f32.mrf.mxu1 }
 0x241   : > { %v616_v57 = vmul.f32 0.01, %v573_v26  ;;  %vm600_vm6 = vcmp.ge.f32.partialorder %v573_v26, 0.0  ;;  %v552_v55 = vadd.f32 %v551_v28, %v512_v27 }
 0x243   : > { %v632_v32 = vsel %vm600_vm6, %v573_v26, %v616_v57  ;;  %v609_v35 = vmul.f32 0.01, %v552_v55  ;;  %vm593_vm7 = vcmp.ge.f32.partialorder %v552_v55, 0.0 }
 0x244   : > { %650 = vperm.xlu0 %1069, %v624_v31   ;;  %690 = vperm.xlu2 %1068, %v632_v32  }
 0x245   : > { %v625_v49 = vsel %vm593_vm7, %v552_v55, %v609_v35 }
 0x246   : > { %v575_v34 = vpop.f32.mrf.mxu3 }
 0x247   : > { %v576_v42 = vadd.f32 %v575_v34, %v520_v33 }
 0x248   : > { %v554_v44 = vpop.f32.mrf.mxu1 }
 0x249   : > { %v617_v47 = vmul.f32 0.01, %v576_v42  ;;  %vm601_vm8 = vcmp.ge.f32.partialorder %v576_v42, 0.0  ;;  %v555_v48 = vadd.f32 %v554_v44, %v513_v43 }
 0x24b   : > { %v633_v50 = vsel %vm601_vm8, %v576_v42, %v617_v47  ;;  %v610_v54 = vmul.f32 0.01, %v555_v48  ;;  %vm594_vm9 = vcmp.ge.f32.partialorder %v555_v48, 0.0 }
 0x24c   : > { %655 = vperm.xlu2 %1068, %v625_v49   ;;  %695 = vperm.xlu1 %1067, %v633_v50  }
 0x24d   : > { %v626_v3 = vsel %vm594_vm9, %v555_v48, %v610_v54 }
 0x24e   : > { %v578_v52 = vpop.f32.mrf.mxu3 }
 0x24f   : > { %v579_v56 = vadd.f32 %v578_v52, %v521_v51 }
 0x250   : > { %v557_v58 = vpop.f32.mrf.mxu1 }
 0x251   : > { %v618_v59 = vmul.f32 0.01, %v579_v56  ;;  %v558_v61 = vadd.f32 %v557_v58, %v514_v53  ;;  %vm602_vm10 = vcmp.ge.f32.partialorder %v579_v56, 0.0 }
 0x253   : > { %v611_v63 = vmul.f32 0.01, %v558_v61  ;;  %v634_v1 = vsel %vm602_vm10, %v579_v56, %v618_v59  ;;  %vm595_vm11 = vcmp.ge.f32.partialorder %v558_v61, 0.0 }
 0x254   : > { %700 = vperm.xlu0 %1069, %v634_v1   ;;  %660 = vperm.xlu1 %1067, %v626_v3  }
 0x255   : > { %v627_v4 = vsel %vm595_vm11, %v558_v61, %v611_v63 }
 0x256   : > { %v581_v5 = vpop.f32.mrf.mxu3  ;;  %665 = vperm.xlu2 %1068, %v627_v4  }
 0x257   : > { %v582_v24 = vadd.f32 %v581_v5, %v522_v17 }
 0x258   : > { %v560_v7 = vpop.f32.mrf.mxu1 }
 0x259   : > { %v561_v8 = vadd.f32 %v560_v7, %v515_v6  ;;  %v619_v28 = vmul.f32 0.01, %v582_v24  ;;  %vm603_vm0 = vcmp.ge.f32.partialorder %v582_v24, 0.0 }
 0x25b   : > { %v612_v2 = vmul.f32 0.01, %v561_v8  ;;  %vm596_vm12 = vcmp.ge.f32.partialorder %v561_v8, 0.0  ;;  %v635_v31 = vsel %vm603_vm0, %v582_v24, %v619_v28 }
 0x25d   : > { %v628_v10 = vsel %vm596_vm12, %v561_v8, %v612_v2 }
 0x25e   : > { %v584_v11 = vpop.f32.mrf.mxu3  ;;  %670 = vperm.xlu1 %1067, %v628_v10  }
 0x25f   : > { %v585_v12 = vadd.f32 %v584_v11, %v523_v9 }
 0x260   : > { %v563_v15 = vpop.f32.mrf.mxu1 }
 0x261   : > { %v620_v16 = vmul.f32 0.01, %v585_v12  ;;  %v564_v62 = vadd.f32 %v563_v15, %v516_v0  ;;  %vm604_vm13 = vcmp.ge.f32.partialorder %v585_v12, 0.0 }
 0x263   : > { %v613_v22 = vmul.f32 0.01, %v564_v62  ;;  %vm597_vm14 = vcmp.ge.f32.partialorder %v564_v62, 0.0  ;;  %v636_v25 = vsel %vm604_vm13, %v585_v12, %v620_v16 }
 0x265   : > { %v629_v60 = vsel %vm597_vm14, %v564_v62, %v613_v22 }
 0x266   : > { %v587_v26 = vpop.f32.mrf.mxu3  ;;  %675 = vperm.xlu2 %1068, %v629_v60   ;;  %710 = vperm.xlu1 %1067, %v636_v25  }
 0x267   : > { %v588_v27 = vadd.f32 %v587_v26, %v524_v23 }
 0x269   : > { %v621_v57 = vmul.f32 0.01, %v588_v27  ;;  %vm605_vm15 = vcmp.ge.f32.partialorder %v588_v27, 0.0 }
 0x26b   : > { %v637_v55 = vsel %vm605_vm15, %v588_v27, %v621_v57  ;;  %v1072_v27 = vld [vmem:[%s1314_s25 + $0xb0] sm:$0xff]  ;;  %v1073_v57 = vld [vmem:[%s1314_s25 + $0xb8] sm:$0xff] }
 0x26c   : > { %715 = vperm.xlu0 %1069, %v637_v55  }
 0x26e   : > { %705 = vperm.xlu2 %1068, %v635_v31  }
 0x290   : > { %v646_v32 = vpop.permute.xlu2 %645 }
 0x291   : > { %v720_v33 = vmul.f32 %v646_v32, %v1381_v40  ;;  %v721_v34 = vmul.f32 %v646_v32, %v1384_v41  ;;  %v1074_v32 = vld [vmem:[%s1314_s25 + $0x70] sm:$0xff] }
 0x293   : > { %vm752_vm1 = vcmp.ge.f32.partialorder %v720_v33, 0.0  ;;  %vm753_vm2 = vcmp.ge.f32.partialorder %v721_v34, 0.0  ;;  %v784_v35 = vmul.f32 0.01, %v720_v33  ;;  %v785_v42 = vmul.f32 0.01, %v721_v34 }
 0x295   : > { %v816_v43 = vsel %vm752_vm1, %v720_v33, %v784_v35  ;;  %v817_v44 = vsel %vm753_vm2, %v721_v34, %v785_v42  ;;  %v1075_v34 = vld [vmem:[%s1314_s25 + $0x78] sm:$0xff] }
 0x296   : > { %848 = vst [vmem:[%s1611_s11 + $0x10] sm:$0xff] %v816_v43 }
 0x297   : > { %849 = vst [vmem:[%s1611_s11 + $0x18] sm:$0xff] %v817_v44 }
 0x29e   : > { %v691_v47 = vpop.permute.xlu2 %690 }
 0x29f   : > { %v738_v40 = vmul.f32 %v691_v47, %v1331_v13  ;;  %v739_v41 = vmul.f32 %v691_v47, %v1334_v14 }
 0x2a0   : > { %v641_v48 = vpop.permute.xlu1 %640 }
 0x2a1   : > { %vm770_vm3 = vcmp.ge.f32.partialorder %v738_v40, 0.0  ;;  %vm771_vm4 = vcmp.ge.f32.partialorder %v739_v41, 0.0  ;;  %v802_v49 = vmul.f32 0.01, %v738_v40  ;;  %v803_v50 = vmul.f32 0.01, %v739_v41 }
 0x2a2   : > { %v718_v51 = vmul.f32 %v641_v48, %v1393_v45  ;;  %v719_v52 = vmul.f32 %v641_v48, %v1396_v46 }
 0x2a3   : > { %v834_v53 = vsel %vm770_vm3, %v738_v40, %v802_v49  ;;  %v835_v54 = vsel %vm771_vm4, %v739_v41, %v803_v50  ;;  %v1076_v50 = vld [vmem:[%s1314_s25 + $0xc0] sm:$0xff] }
 0x2a4   : > { %866 = vst [vmem:[%s1611_s11 + $0xa0] sm:$0xff] %v834_v53  ;;  %vm750_vm5 = vcmp.ge.f32.partialorder %v718_v51, 0.0  ;;  %vm751_vm6 = vcmp.ge.f32.partialorder %v719_v52, 0.0  ;;  %v782_v56 = vmul.f32 0.01, %v718_v51 }
 0x2a5   : > { %867 = vst [vmem:[%s1611_s11 + $0xa8] sm:$0xff] %v835_v54  ;;  %v783_v13 = vmul.f32 0.01, %v719_v52  ;;  %v1078_v54 = vld [vmem:[%s1314_s25 + $0x40] sm:$0xff] }
 0x2a6   : > { %v814_v14 = vsel %vm750_vm5, %v718_v51, %v782_v56  ;;  %v656_v58 = vpop.permute.xlu2 %655 }
 0x2a7   : > { %v815_v59 = vsel %vm751_vm6, %v719_v52, %v783_v13  ;;  %846 = vst [vmem:[%s1611_s11] sm:$0xff] %v814_v14  ;;  %v724_v61 = vmul.f32 %v656_v58, %v1369_v36  ;;  %v725_v45 = vmul.f32 %v656_v58, %v1372_v37  ;;  %v1077_v52 = vld [vmem:[%s1314_s25 + $0xc8] sm:$0xff] }
 0x2a8   : > { %847 = vst [vmem:[%s1611_s11 + $0x8] sm:$0xff] %v815_v59  ;;  %v681_v46 = vpop.permute.xlu1 %680  ;;  %v1079_v13 = vld [vmem:[%s1314_s25 + $0x48] sm:$0xff] }
 0x2a9   : > { %vm756_vm7 = vcmp.ge.f32.partialorder %v724_v61, 0.0  ;;  %vm757_vm8 = vcmp.ge.f32.partialorder %v725_v45, 0.0  ;;  %v788_v63 = vmul.f32 0.01, %v724_v61  ;;  %v789_v1 = vmul.f32 0.01, %v725_v45 }
 0x2aa   : > { %v734_v3 = vmul.f32 %v681_v46, %v1345_v20  ;;  %v735_v4 = vmul.f32 %v681_v46, %v1348_v21 }
 0x2ab   : > { %v820_v5 = vsel %vm756_vm7, %v724_v61, %v788_v63  ;;  %v821_v6 = vsel %vm757_vm8, %v725_v45, %v789_v1 }
 0x2ac   : > { %852 = vst [vmem:[%s1611_s11 + $0x30] sm:$0xff] %v820_v5  ;;  %vm766_vm9 = vcmp.ge.f32.partialorder %v734_v3, 0.0  ;;  %vm767_vm10 = vcmp.ge.f32.partialorder %v735_v4, 0.0  ;;  %v798_v36 = vmul.f32 0.01, %v734_v3  ;;  %v1081_v5 = vld [vmem:[%s1314_s25 + $0xd8] sm:$0xff] }
 0x2ad   : > { %853 = vst [vmem:[%s1611_s11 + $0x38] sm:$0xff] %v821_v6  ;;  %v799_v37 = vmul.f32 0.01, %v735_v4 }
 0x2ae   : > { %v830_v7 = vsel %vm766_vm9, %v734_v3, %v798_v36  ;;  %v686_v8 = vpop.permute.xlu0 %685  ;;  %v1080_v3 = vld [vmem:[%s1314_s25 + $0xd0] sm:$0xff] }
 0x2af   : > { %v831_v2 = vsel %vm767_vm10, %v735_v4, %v799_v37  ;;  %862 = vst [vmem:[%s1611_s11 + $0x80] sm:$0xff] %v830_v7  ;;  %v736_v9 = vmul.f32 %v686_v8, %v1339_v18  ;;  %v737_v20 = vmul.f32 %v686_v8, %v1342_v19 }
 0x2b0   : > { %863 = vst [vmem:[%s1611_s11 + $0x88] sm:$0xff] %v831_v2  ;;  %v666_v21 = vpop.permute.xlu2 %665 }
 0x2b1   : > { %vm768_vm11 = vcmp.ge.f32.partialorder %v736_v9, 0.0  ;;  %vm769_vm12 = vcmp.ge.f32.partialorder %v737_v20, 0.0  ;;  %v800_v10 = vmul.f32 0.01, %v736_v9  ;;  %v801_v11 = vmul.f32 0.01, %v737_v20 }
 0x2b2   : > { %v728_v0 = vmul.f32 %v666_v21, %v1359_v29  ;;  %v729_v12 = vmul.f32 %v666_v21, %v1362_v30  ;;  %v1082_v21 = vld [vmem:[%s1314_s25 + $0x60] sm:$0xff] }
 0x2b3   : > { %v832_v15 = vsel %vm768_vm11, %v736_v9, %v800_v10  ;;  %v833_v16 = vsel %vm769_vm12, %v737_v20, %v801_v11  ;;  %v1083_v11 = vld [vmem:[%s1314_s25 + $0x68] sm:$0xff] }
 0x2b4   : > { %864 = vst [vmem:[%s1611_s11 + $0x90] sm:$0xff] %v832_v15  ;;  %vm760_vm13 = vcmp.ge.f32.partialorder %v728_v0, 0.0  ;;  %vm761_vm14 = vcmp.ge.f32.partialorder %v729_v12, 0.0  ;;  %v792_v18 = vmul.f32 0.01, %v728_v0 }
 0x2b5   : > { %865 = vst [vmem:[%s1611_s11 + $0x98] sm:$0xff] %v833_v16  ;;  %v793_v19 = vmul.f32 0.01, %v729_v12 }
 0x2b6   : > { %v824_v62 = vsel %vm760_vm13, %v728_v0, %v792_v18  ;;  %v651_v17 = vpop.permute.xlu0 %650 }
 0x2b7   : > { %v825_v22 = vsel %vm761_vm14, %v729_v12, %v793_v19  ;;  %856 = vst [vmem:[%s1611_s11 + $0x50] sm:$0xff] %v824_v62  ;;  %v722_v29 = vmul.f32 %v651_v17, %v1375_v38  ;;  %v723_v30 = vmul.f32 %v651_v17, %v1378_v39  ;;  %v1084_v62 = vld [vmem:[%s1314_s25 + $0xe0] sm:$0xff] }
 0x2b8   : > { %857 = vst [vmem:[%s1611_s11 + $0x58] sm:$0xff] %v825_v22  ;;  %v1085_v22 = vld [vmem:[%s1314_s25 + $0xe8] sm:$0xff] }
 0x2b9   : > { %vm754_vm15 = vcmp.ge.f32.partialorder %v722_v29, 0.0  ;;  %vm755_vm0 = vcmp.ge.f32.partialorder %v723_v30, 0.0  ;;  %v786_v23 = vmul.f32 0.01, %v722_v29  ;;  %v787_v24 = vmul.f32 0.01, %v723_v30 }
 0x2bb   : > { %v818_v60 = vsel %vm754_vm15, %v722_v29, %v786_v23  ;;  %v819_v25 = vsel %vm755_vm0, %v723_v30, %v787_v24 }
 0x2bc   : > { %850 = vst [vmem:[%s1611_s11 + $0x20] sm:$0xff] %v818_v60 }
 0x2bd   : > { %851 = vst [vmem:[%s1611_s11 + $0x28] sm:$0xff] %v819_v25 }
 0x2be   : > { %v696_v26 = vpop.permute.xlu1 %695 }
 0x2bf   : > { %v740_v28 = vmul.f32 %v1072_v27, %v696_v26  ;;  %v741_v55 = vmul.f32 %v1073_v57, %v696_v26  ;;  %v1086_v26 = vld [vmem:[%s1314_s25 + $0xf0] sm:$0xff] }
 0x2c0   : > { %v676_v38 = vpop.permute.xlu2 %675 }
 0x2c1   : > { %vm772_vm1 = vcmp.ge.f32.partialorder %v740_v28, 0.0  ;;  %vm773_vm2 = vcmp.ge.f32.partialorder %v741_v55, 0.0  ;;  %v804_v39 = vmul.f32 0.01, %v740_v28  ;;  %v805_v31 = vmul.f32 0.01, %v741_v55 }
 0x2c2   : > { %v732_v33 = vmul.f32 %v1074_v32, %v676_v38  ;;  %v733_v35 = vmul.f32 %v1075_v34, %v676_v38 }
 0x2c3   : > { %v836_v42 = vsel %vm772_vm1, %v740_v28, %v804_v39  ;;  %v837_v43 = vsel %vm773_vm2, %v741_v55, %v805_v31  ;;  %v1087_v28 = vld [vmem:[%s1314_s25 + $0xf8] sm:$0xff] }
 0x2c4   : > { %868 = vst [vmem:[%s1611_s11 + $0xb0] sm:$0xff] %v836_v42  ;;  %vm764_vm3 = vcmp.ge.f32.partialorder %v732_v33, 0.0  ;;  %vm765_vm4 = vcmp.ge.f32.partialorder %v733_v35, 0.0  ;;  %v796_v44 = vmul.f32 0.01, %v732_v33 }
 0x2c5   : > { %869 = vst [vmem:[%s1611_s11 + $0xb8] sm:$0xff] %v837_v43  ;;  %v797_v47 = vmul.f32 0.01, %v733_v35 }
 0x2c6   : > { %v828_v40 = vsel %vm764_vm3, %v732_v33, %v796_v44  ;;  %v701_v41 = vpop.permute.xlu0 %700  ;;  %v661_v48 = vpop.permute.xlu1 %660 }
 0x2c7   : > { %v829_v49 = vsel %vm765_vm4, %v733_v35, %v797_v47  ;;  %860 = vst [vmem:[%s1611_s11 + $0x70] sm:$0xff] %v828_v40  ;;  %v742_v51 = vmul.f32 %v1076_v50, %v701_v41  ;;  %v743_v53 = vmul.f32 %v1077_v52, %v701_v41  ;;  %v726_v56 = vmul.f32 %v1078_v54, %v661_v48 }
 0x2c8   : > { %861 = vst [vmem:[%s1611_s11 + $0x78] sm:$0xff] %v829_v49  ;;  %v727_v14 = vmul.f32 %v1079_v13, %v661_v48  ;;  %v706_v58 = vpop.permute.xlu2 %705 }
 0x2c9   : > { %vm774_vm5 = vcmp.ge.f32.partialorder %v742_v51, 0.0  ;;  %vm775_vm6 = vcmp.ge.f32.partialorder %v743_v53, 0.0  ;;  %v806_v59 = vmul.f32 0.01, %v742_v51  ;;  %v807_v61 = vmul.f32 0.01, %v743_v53 }
 0x2ca   : > { %vm758_vm7 = vcmp.ge.f32.partialorder %v726_v56, 0.0  ;;  %vm759_vm8 = vcmp.ge.f32.partialorder %v727_v14, 0.0  ;;  %v790_v45 = vmul.f32 0.01, %v726_v56  ;;  %v791_v46 = vmul.f32 0.01, %v727_v14 }
 0x2cb   : > { %v838_v63 = vsel %vm774_vm5, %v742_v51, %v806_v59  ;;  %v839_v1 = vsel %vm775_vm6, %v743_v53, %v807_v61  ;;  %v744_v4 = vmul.f32 %v1080_v3, %v706_v58  ;;  %v745_v6 = vmul.f32 %v1081_v5, %v706_v58 }
 0x2cc   : > { %870 = vst [vmem:[%s1611_s11 + $0xc0] sm:$0xff] %v838_v63  ;;  %v822_v36 = vsel %vm758_vm7, %v726_v56, %v790_v45  ;;  %v823_v37 = vsel %vm759_vm8, %v727_v14, %v791_v46 }
 0x2cd   : > { %871 = vst [vmem:[%s1611_s11 + $0xc8] sm:$0xff] %v839_v1  ;;  %vm776_vm9 = vcmp.ge.f32.partialorder %v744_v4, 0.0  ;;  %vm777_vm10 = vcmp.ge.f32.partialorder %v745_v6, 0.0  ;;  %v808_v7 = vmul.f32 0.01, %v744_v4 }
 0x2ce   : > { %854 = vst [vmem:[%s1611_s11 + $0x40] sm:$0xff] %v822_v36  ;;  %v809_v8 = vmul.f32 0.01, %v745_v6 }
 0x2cf   : > { %855 = vst [vmem:[%s1611_s11 + $0x48] sm:$0xff] %v823_v37  ;;  %v840_v2 = vsel %vm776_vm9, %v744_v4, %v808_v7 }
 0x2d0   : > { %v841_v9 = vsel %vm777_vm10, %v745_v6, %v809_v8  ;;  %872 = vst [vmem:[%s1611_s11 + $0xd0] sm:$0xff] %v840_v2  ;;  %v671_v20 = vpop.permute.xlu1 %670 }
 0x2d1   : > { %873 = vst [vmem:[%s1611_s11 + $0xd8] sm:$0xff] %v841_v9  ;;  %v730_v10 = vmul.f32 %v1082_v21, %v671_v20  ;;  %v731_v0 = vmul.f32 %v1083_v11, %v671_v20 }
 0x2d3   : > { %vm762_vm11 = vcmp.ge.f32.partialorder %v730_v10, 0.0  ;;  %vm763_vm12 = vcmp.ge.f32.partialorder %v731_v0, 0.0  ;;  %v794_v12 = vmul.f32 0.01, %v730_v10  ;;  %v795_v15 = vmul.f32 0.01, %v731_v0 }
 0x2d5   : > { %v826_v16 = vsel %vm762_vm11, %v730_v10, %v794_v12  ;;  %v827_v18 = vsel %vm763_vm12, %v731_v0, %v795_v15 }
 0x2d6   : > { %858 = vst [vmem:[%s1611_s11 + $0x60] sm:$0xff] %v826_v16 }
 0x2d7   : > { %859 = vst [vmem:[%s1611_s11 + $0x68] sm:$0xff] %v827_v18 }
 0x2d8   : > { %v711_v19 = vpop.permute.xlu1 %710 }
 0x2d9   : > { %v746_v17 = vmul.f32 %v1084_v62, %v711_v19  ;;  %v747_v29 = vmul.f32 %v1085_v22, %v711_v19 }
 0x2db   : > { %vm778_vm13 = vcmp.ge.f32.partialorder %v746_v17, 0.0  ;;  %vm779_vm14 = vcmp.ge.f32.partialorder %v747_v29, 0.0  ;;  %v810_v30 = vmul.f32 0.01, %v746_v17  ;;  %v811_v23 = vmul.f32 0.01, %v747_v29 }
 0x2dd   : > { %v842_v24 = vsel %vm778_vm13, %v746_v17, %v810_v30  ;;  %v843_v60 = vsel %vm779_vm14, %v747_v29, %v811_v23 }
 0x2de   : > { %874 = vst [vmem:[%s1611_s11 + $0xe0] sm:$0xff] %v842_v24  ;;  %v716_v25 = vpop.permute.xlu0 %715 }
 0x2df   : > { %875 = vst [vmem:[%s1611_s11 + $0xe8] sm:$0xff] %v843_v60  ;;  %v748_v27 = vmul.f32 %v1086_v26, %v716_v25  ;;  %v749_v57 = vmul.f32 %v1087_v28, %v716_v25 }
 0x2e1   : > { %vm780_vm15 = vcmp.ge.f32.partialorder %v748_v27, 0.0  ;;  %vm781_vm0 = vcmp.ge.f32.partialorder %v749_v57, 0.0  ;;  %v812_v55 = vmul.f32 0.01, %v748_v27  ;;  %v813_v38 = vmul.f32 0.01, %v749_v57 }
 0x2e3   : > { %v844_v39 = vsel %vm780_vm15, %v748_v27, %v812_v55  ;;  %v845_v31 = vsel %vm781_vm0, %v749_v57, %v813_v38 }
 0x2e4   : > { %876 = vst [vmem:[%s1611_s11 + $0xf0] sm:$0xff] %v844_v39 }
 0x2e5   : > { %877 = vst [vmem:[%s1611_s11 + $0xf8] sm:$0xff] %v845_v31 }
 0x2e6   : > { %1145 = shalt.err (!%p1142_p4)
}
 0x2e7   : > { %s1190_s12 = smov 256   ;;  %s1191_s7 = smov 16  }
 0x2e8   : > { %1017 = dma.vmem_to_hbm [thread:$0]  (%p1272_p11), %s892_s22, 4096, %s894_s15, %s879_s16, %s1190_s12, %s1190_s12, %s1191_s7  }
 0x2e9 PF: > { %s908_s11 = sand.u32 1, %s1172_s18   ;;  %p1720_p7 = scmp.ge.s32.totalorder %s1184_s21, 2 }
 0x2ea   : > { %s909_s14 = scalar_lea.sflag [#allocation4], %s908_s11 }
 0x2eb   : > { %p1024_p5 = pnand %p1720_p7, %p1276_p12 }
 0x2ed   : > { %p1025_p8 = pneg %p1024_p5 }
 0x2ef   : > { %1167 = dma.done.wait (%p1025_p8), %s909_s14, 4096  }
 0x2f0   : > { %1169 = vsyncadd (%p1025_p8), %s909_s14, 4294963200  ;;  %p18_p10 = scmp.ge.s32.totalorder %s1247_s24, 4   ;;  %s1721_s18 = smov %s1176_s19 }
 0x2f1   : > { %s1722_s19 = smov %s1180_s20  ;;  %s1723_s20 = smov %s1259_s27 }
 0x2f2   : > { %s1724_s21 = smov %s1247_s24  ;;  %20 = sbr.rel (!%p18_p10) target bundleno = 5 (0x5), region = 85 }
 0x2f7   :  { %915 = vsyncpa [#allocation3], 1 }
 0x2f8   :  { %917 = vsyncpa [#allocation3 + $0x1], 1 }
 0x2f9   :  { %918 = vsyncpa [#allocation4], 1 }
 0x2fa   :  { %920 = vsyncpa [#allocation4 + $0x1], 1 }

</bundles_post_ra>
